<compile_context>
chip_gen: v5e
topology: v5e:2x2
jax: 0.10.0
libtpu: 0.0.40
codegen_flags: <defaults>
</compile_context>

<pallas_src>
import math
import functools

import jax
import jax.numpy as jnp
from jax import lax
from jax.experimental import pallas as pl
from jax.experimental.pallas import tpu as pltpu


def _mha_kernel(q_ref, k_ref, v_ref,
                wq_ref, bq_ref, wk_ref, bk_ref, wv_ref, bv_ref,
                wo_ref, bo_ref,
                o_ref,
                q_scr, k_scr, v_scr, ctx_scr,
                *, n_heads, head_dim, inv_scale):
    f32 = jnp.float32
    bf16 = jnp.bfloat16
    qt = pl.program_id(1)

    # K/V projections: once per batch element (first q-tile step), stored in
    # persistent bf16 VMEM scratch and reused by all subsequent q tiles.
    @pl.when(qt == 0)
    def _():
        xk = k_ref[...].astype(bf16)                                   # (S_k, D)
        xv = v_ref[...].astype(bf16)
        K = jnp.dot(xk, wk_ref[...], preferred_element_type=f32) + bk_ref[...]
        V = jnp.dot(xv, wv_ref[...], preferred_element_type=f32) + bv_ref[...]
        k_scr[...] = K.astype(bf16)
        v_scr[...] = V.astype(bf16)

    # Q projection for this q tile.  The combined 1/(sqrt(Dh)*sqrt(S_key)) scale is
    # folded into Q once (O(TQ*D)) instead of scaling every (TQ, S_k) score matrix.
    xq = q_ref[...].astype(bf16)                                       # (TQ, D)
    Q = jnp.dot(xq, wq_ref[...], preferred_element_type=f32) + bq_ref[...]
    q_scr[...] = (Q * inv_scale).astype(bf16)

    # Per-head attention.  Each head's context lands in its lane slot of a
    # lane-dense (TQ, D) f32 slab; no lane-axis concatenate, no narrow matmuls.
    for h in range(n_heads):
        sl = slice(h * head_dim, (h + 1) * head_dim)
        qh = q_scr[:, sl]                       # (TQ, Dh) bf16
        kh = k_scr[:, sl]                       # (S_k, Dh) bf16
        vh = v_scr[:, sl]                       # (S_k, Dh) bf16

        # Q K^T without materialising a transposed K tile (contract last dims).
        scores = lax.dot_general(qh, kh, (((1,), (1,)), ((), ())),
                                 preferred_element_type=f32)           # (TQ, S_k)

        # Numerically stable softmax; divide replaced by EUP reciprocal.
        m = jnp.max(scores, axis=-1, keepdims=True)
        e = jnp.exp(scores - m)
        denom = jnp.sum(e, axis=-1, keepdims=True)
        attn = e * pl.reciprocal(denom, approx=True)

        ctx_scr[:, sl] = jnp.dot(attn.astype(bf16), vh,
                                 preferred_element_type=f32)           # (TQ, Dh)

    # Output projection: ONE full-D contraction (full MXU occupancy), then bias,
    # then a single lane-dense (TQ, D) store.
    out = jnp.dot(ctx_scr[...].astype(bf16), wo_ref[...],
                  preferred_element_type=f32) + bo_ref[...]
    o_ref[...] = out.astype(o_ref.dtype)


def _pick_q_tile(s, target=256):
    """Largest divisor of s that is <= target and a multiple of 8 (or s itself)."""
    if s <= target:
        return s
    start = target - (target % 8)
    for t in range(start, 7, -8):
        if s % t == 0:
            return t
    return s


def multi_head_attention(query, key, value, params, *, n_heads, q_tile=None):
    """query/key/value: (B, S, D) float32. params: (in, out) weights + (1, D) biases."""
    B, S, D = query.shape
    assert D % n_heads == 0
    head_dim = D // n_heads
    S_k = key.shape[1]

    tq = q_tile if q_tile is not None else _pick_q_tile(S)
    assert S % tq == 0 and (tq == S or tq % 8 == 0), "q tile must divide S (mult of 8)"
    n_q_tiles = S // tq

    bf16 = jnp.bfloat16
    wq = params["wq"].astype(bf16)
    wk = params["wk"].astype(bf16)
    wv = params["wv"].astype(bf16)
    wo = params["wo"].astype(bf16)
    bq, bk, bv, bo = params["bq"], params["bk"], params["bv"], params["bo"]

    # Weights / biases: whole-array VMEM residents (single copy, no double-buffering).
    const_spec = pl.BlockSpec(memory_space=pltpu.MemorySpace.VMEM)
    q_spec = pl.BlockSpec((None, tq, D), lambda b, q: (b, q, 0))
    kv_spec = pl.BlockSpec((None, S_k, D), lambda b, q: (b, 0, 0))
    o_spec = pl.BlockSpec((None, tq, D), lambda b, q: (b, q, 0))

    kernel = functools.partial(
        _mha_kernel, n_heads=n_heads, head_dim=head_dim,
        inv_scale=1.0 / (math.sqrt(head_dim) * math.sqrt(S_k)))

    # Explicit scoped-VMEM budget from the per-step footprint (+headroom), clamped
    # to a value safe on every generation (v7x physical VMEM is 64 MiB / TC).
    est = (4 * D * D * 2 + 4 * D * 4                       # bf16 weights + f32 biases
           + 2 * 2 * tq * D * 4                            # double-buffered q in + out
           + 2 * 2 * S_k * D * 4                           # double-buffered k/v inputs
           + 2 * S_k * D * 2                               # K/V bf16 scratch
           + tq * D * 2 + tq * D * 4                       # Q bf16 + ctx f32 scratch
           + 2 * tq * S_k * 4                              # scores / exp temporaries
           + 2 * tq * D * 4)                               # projection temporaries
    vmem_limit = int(min(max(2 * est, 32 * 1024 * 1024), 64 * 1024 * 1024))

    # Advisory cost estimate so XLA schedules surrounding ops sensibly.
    flops = B * (4 * D * D * (S + S_k) + 4 * S * S_k * D)
    transcendentals = B * n_heads * S * (S_k + 1)
    bytes_accessed = (2 * B * S * D + 2 * B * S_k * D) * 4 + 4 * D * D * 2 + 4 * D * 4

    return pl.pallas_call(
        kernel,
        out_shape=jax.ShapeDtypeStruct((B, S, D), query.dtype),
        grid_spec=pltpu.PrefetchScalarGridSpec(
            num_scalar_prefetch=0,
            grid=(B, n_q_tiles),
            in_specs=[q_spec, kv_spec, kv_spec,
                      const_spec, const_spec, const_spec, const_spec,
                      const_spec, const_spec, const_spec, const_spec],
            out_specs=o_spec,
            scratch_shapes=[
                pltpu.VMEM((tq, D), bf16),          # scaled Q (this q tile)
                pltpu.VMEM((S_k, D), bf16),         # projected K (per batch element)
                pltpu.VMEM((S_k, D), bf16),         # projected V (per batch element)
                pltpu.VMEM((tq, D), jnp.float32),   # lane-dense head-context slab
            ]),
        compiler_params=pltpu.CompilerParams(
            dimension_semantics=("parallel", "arbitrary"),
            vmem_limit_bytes=vmem_limit),
        cost_estimate=pl.CostEstimate(
            flops=flops,
            transcendentals=transcendentals,
            bytes_accessed=bytes_accessed),
    )(query, key, value, wq, bq, wk, bk, wv, bv, wo, bo)


def _reference(query, key, value, params, *, n_heads):
    """Pure-JAX f32 reference mirroring the PyTorch forward (mask=None)."""
    B, S, D = query.shape
    Dh = D // n_heads
    Q = query @ params["wq"] + params["bq"][0]
    K = key @ params["wk"] + params["bk"][0]
    V = value @ params["wv"] + params["bv"][0]
    Q = Q.reshape(B, S, n_heads, Dh).transpose(0, 2, 1, 3)
    K = K.reshape(B, -1, n_heads, Dh).transpose(0, 2, 1, 3)
    V = V.reshape(B, -1, n_heads, Dh).transpose(0, 2, 1, 3)
    scores = (Q @ K.transpose(0, 1, 3, 2)) / math.sqrt(Dh)
    scores = scores / math.sqrt(scores.shape[-1])
    attn = jax.nn.softmax(scores, axis=-1)
    ws = (attn @ V).transpose(0, 2, 1, 3).reshape(B, S, D)
    return ws @ params["wo"] + params["bo"][0]


def _init_params(key, d_model):
    """Deterministic init mimicking torch.nn.Linear default (U[-1/sqrt(in), 1/sqrt(in)]).
    Weights returned pre-transposed to (in, out)."""
    bound = 1.0 / math.sqrt(d_model)
    names = ["wq", "bq", "wk", "bk", "wv", "bv", "wo", "bo"]
    keys = jax.random.split(key, len(names))
    params = {}
    for i, name in enumerate(names):
        shape = (d_model, d_model) if name.startswith("w") else (1, d_model)
        params[name] = jax.random.uniform(
            keys[i], shape, jnp.float32, minval=-bound, maxval=bound)
    return params


if __name__ == "__main__":
    def run_case(d_model, n_heads, B, S, seed, q_tile=None):
        root = jax.random.PRNGKey(seed)
        kq, kk, kv, kp = jax.random.split(root, 4)
        query = jax.random.normal(kq, (B, S, d_model), jnp.float32)
        key_in = jax.random.normal(kk, (B, S, d_model), jnp.float32)
        value = jax.random.normal(kv, (B, S, d_model), jnp.float32)
        params = _init_params(kp, d_model)

        out = multi_head_attention(query, key_in, value, params,
                                   n_heads=n_heads, q_tile=q_tile)
        out = jax.block_until_ready(out)
        ref = _reference(query, key_in, value, params, n_heads=n_heads)
        assert out.shape == (B, S, d_model)
        # bf16 matmul operands (f32 accumulation) + approx reciprocal -> loosened tol.
        assert jnp.allclose(out, ref, atol=2e-2, rtol=2e-2), (
            f"mismatch vs reference (d_model={d_model}, n_heads={n_heads}, S={S})")

    # Small shapes consistent with the module.
    run_case(d_model=32, n_heads=4, B=2, S=8, seed=0)
    # Lane-aligned d_model with multiple q tiles (exercises pl.when K/V-scratch reuse).
    run_case(d_model=128, n_heads=2, B=2, S=16, seed=1, q_tile=8)

    print("KERNEL_OK")
</pallas_src>

<mosaic_0001>
module attributes {stable_mosaic.version = 11 : i64} {
  func.func @_mha_kernel(%arg0: i32, %arg1: i32, %arg2: memref<1x8x32xf32, #tpu.memory_space<vmem>>, %arg3: memref<1x8x32xf32, #tpu.memory_space<vmem>>, %arg4: memref<1x8x32xf32, #tpu.memory_space<vmem>>, %arg5: memref<32x32xbf16, #tpu.memory_space<vmem>>, %arg6: memref<1x32xf32, #tpu.memory_space<vmem>>, %arg7: memref<32x32xbf16, #tpu.memory_space<vmem>>, %arg8: memref<1x32xf32, #tpu.memory_space<vmem>>, %arg9: memref<32x32xbf16, #tpu.memory_space<vmem>>, %arg10: memref<1x32xf32, #tpu.memory_space<vmem>>, %arg11: memref<32x32xbf16, #tpu.memory_space<vmem>>, %arg12: memref<1x32xf32, #tpu.memory_space<vmem>>, %arg13: memref<1x8x32xf32, #tpu.memory_space<vmem>>, %arg14: memref<8x32xbf16, #tpu.memory_space<vmem>>, %arg15: memref<8x32xbf16, #tpu.memory_space<vmem>>, %arg16: memref<8x32xbf16, #tpu.memory_space<vmem>>, %arg17: memref<8x32xf32, #tpu.memory_space<vmem>>) attributes {dimension_semantics = [#tpu.dimension_semantics<parallel>, #tpu.dimension_semantics<arbitrary>], iteration_bounds = array<i64: 2, 1>, scalar_prefetch = 0 : i64, scratch_operands = 4 : i64, tpu.core_type = #tpu.core_type<tc>, window_params = [{transform_indices = @transform_0, window_bounds = array<i64: 1, 8, 32>}, {transform_indices = @transform_1, window_bounds = array<i64: 1, 8, 32>}, {transform_indices = @transform_2, window_bounds = array<i64: 1, 8, 32>}, {pipeline_mode = #tpu.pipeline_mode<synchronous>, transform_indices = @transform_3, window_bounds = array<i64: 32, 32>}, {pipeline_mode = #tpu.pipeline_mode<synchronous>, transform_indices = @transform_4, window_bounds = array<i64: 1, 32>}, {pipeline_mode = #tpu.pipeline_mode<synchronous>, transform_indices = @transform_5, window_bounds = array<i64: 32, 32>}, {pipeline_mode = #tpu.pipeline_mode<synchronous>, transform_indices = @transform_6, window_bounds = array<i64: 1, 32>}, {pipeline_mode = #tpu.pipeline_mode<synchronous>, transform_indices = @transform_7, window_bounds = array<i64: 32, 32>}, {pipeline_mode = #tpu.pipeline_mode<synchronous>, transform_indices = @transform_8, window_bounds = array<i64: 1, 32>}, {pipeline_mode = #tpu.pipeline_mode<synchronous>, transform_indices = @transform_9, window_bounds = array<i64: 32, 32>}, {pipeline_mode = #tpu.pipeline_mode<synchronous>, transform_indices = @transform_10, window_bounds = array<i64: 1, 32>}, {transform_indices = @transform_11, window_bounds = array<i64: 1, 8, 32>}]} {
    %c0_i32 = arith.constant 0 : i32
    %0 = arith.cmpi eq, %arg1, %c0_i32 : i32
    %1 = arith.extui %0 : i1 to i32
    %c0_i32_0 = arith.constant 0 : i32
    %2 = arith.cmpi ne, %1, %c0_i32_0 : i32
    scf.if %2 {
      %c0_65 = arith.constant 0 : index
      %c0_66 = arith.constant 0 : index
      %c0_67 = arith.constant 0 : index
      %93 = vector.load %arg3[%c0_65, %c0_66, %c0_67] : memref<1x8x32xf32, #tpu.memory_space<vmem>>, vector<1x8x32xf32>
      %94 = vector.shape_cast %93 : vector<1x8x32xf32> to vector<8x32xf32>
      %95 = arith.truncf %94 : vector<8x32xf32> to vector<8x32xbf16>
      %c0_68 = arith.constant 0 : index
      %c0_69 = arith.constant 0 : index
      %c0_70 = arith.constant 0 : index
      %96 = vector.load %arg4[%c0_68, %c0_69, %c0_70] : memref<1x8x32xf32, #tpu.memory_space<vmem>>, vector<1x8x32xf32>
      %97 = vector.shape_cast %96 : vector<1x8x32xf32> to vector<8x32xf32>
      %98 = arith.truncf %97 : vector<8x32xf32> to vector<8x32xbf16>
      %c0_71 = arith.constant 0 : index
      %c0_72 = arith.constant 0 : index
      %99 = vector.load %arg7[%c0_71, %c0_72] : memref<32x32xbf16, #tpu.memory_space<vmem>>, vector<32x32xbf16>
      %cst_73 = arith.constant dense<0.000000e+00> : vector<8x32xf32>
      %100 = tpu.matmul %95, %99, %cst_73 {dimension_numbers = #tpu.dot_dimension_numbers<[1], [0], [0], [1], [0, 0, 1, 1], [], []>} : vector<8x32xbf16>, vector<32x32xbf16>, vector<8x32xf32> -> vector<8x32xf32>
      %c0_74 = arith.constant 0 : index
      %c0_75 = arith.constant 0 : index
      %101 = vector.load %arg8[%c0_74, %c0_75] : memref<1x32xf32, #tpu.memory_space<vmem>>, vector<1x32xf32>
      %102 = vector.broadcast %101 : vector<1x32xf32> to vector<8x32xf32>
      %103 = arith.addf %100, %102 : vector<8x32xf32>
      %c0_76 = arith.constant 0 : index
      %c0_77 = arith.constant 0 : index
      %104 = vector.load %arg9[%c0_76, %c0_77] : memref<32x32xbf16, #tpu.memory_space<vmem>>, vector<32x32xbf16>
      %cst_78 = arith.constant dense<0.000000e+00> : vector<8x32xf32>
      %105 = tpu.matmul %98, %104, %cst_78 {dimension_numbers = #tpu.dot_dimension_numbers<[1], [0], [0], [1], [0, 0, 1, 1], [], []>} : vector<8x32xbf16>, vector<32x32xbf16>, vector<8x32xf32> -> vector<8x32xf32>
      %c0_79 = arith.constant 0 : index
      %c0_80 = arith.constant 0 : index
      %106 = vector.load %arg10[%c0_79, %c0_80] : memref<1x32xf32, #tpu.memory_space<vmem>>, vector<1x32xf32>
      %107 = vector.broadcast %106 : vector<1x32xf32> to vector<8x32xf32>
      %108 = arith.addf %105, %107 : vector<8x32xf32>
      %109 = arith.truncf %103 : vector<8x32xf32> to vector<8x32xbf16>
      %c0_81 = arith.constant 0 : index
      %c0_82 = arith.constant 0 : index
      %110 = vector.load %arg15[%c0_81, %c0_82] : memref<8x32xbf16, #tpu.memory_space<vmem>>, vector<8x32xbf16>
      tpu.vector_store %arg15[%c0_81, %c0_82], %109 {strides = array<i32>} : memref<8x32xbf16, #tpu.memory_space<vmem>>, vector<8x32xbf16>,
      %111 = arith.truncf %108 : vector<8x32xf32> to vector<8x32xbf16>
      %c0_83 = arith.constant 0 : index
      %c0_84 = arith.constant 0 : index
      %112 = vector.load %arg16[%c0_83, %c0_84] : memref<8x32xbf16, #tpu.memory_space<vmem>>, vector<8x32xbf16>
      tpu.vector_store %arg16[%c0_83, %c0_84], %111 {strides = array<i32>} : memref<8x32xbf16, #tpu.memory_space<vmem>>, vector<8x32xbf16>,
    } else {
    }
    %c0 = arith.constant 0 : index
    %c0_1 = arith.constant 0 : index
    %c0_2 = arith.constant 0 : index
    %3 = vector.load %arg2[%c0, %c0_1, %c0_2] : memref<1x8x32xf32, #tpu.memory_space<vmem>>, vector<1x8x32xf32>
    %4 = vector.shape_cast %3 : vector<1x8x32xf32> to vector<8x32xf32>
    %5 = arith.truncf %4 : vector<8x32xf32> to vector<8x32xbf16>
    %c0_3 = arith.constant 0 : index
    %c0_4 = arith.constant 0 : index
    %6 = vector.load %arg5[%c0_3, %c0_4] : memref<32x32xbf16, #tpu.memory_space<vmem>>, vector<32x32xbf16>
    %cst = arith.constant dense<0.000000e+00> : vector<8x32xf32>
    %7 = tpu.matmul %5, %6, %cst {dimension_numbers = #tpu.dot_dimension_numbers<[1], [0], [0], [1], [0, 0, 1, 1], [], []>} : vector<8x32xbf16>, vector<32x32xbf16>, vector<8x32xf32> -> vector<8x32xf32>
    %c0_5 = arith.constant 0 : index
    %c0_6 = arith.constant 0 : index
    %8 = vector.load %arg6[%c0_5, %c0_6] : memref<1x32xf32, #tpu.memory_space<vmem>>, vector<1x32xf32>
    %9 = vector.broadcast %8 : vector<1x32xf32> to vector<8x32xf32>
    %10 = arith.addf %7, %9 : vector<8x32xf32>
    %cst_7 = arith.constant 1.250000e-01 : f32
    %11 = vector.broadcast %cst_7 : f32 to vector<8x32xf32>
    %12 = arith.mulf %10, %11 : vector<8x32xf32>
    %13 = arith.truncf %12 : vector<8x32xf32> to vector<8x32xbf16>
    %c0_8 = arith.constant 0 : index
    %c0_9 = arith.constant 0 : index
    %14 = vector.load %arg14[%c0_8, %c0_9] : memref<8x32xbf16, #tpu.memory_space<vmem>>, vector<8x32xbf16>
    tpu.vector_store %arg14[%c0_8, %c0_9], %13 {strides = array<i32>} : memref<8x32xbf16, #tpu.memory_space<vmem>>, vector<8x32xbf16>,
    %c0_10 = arith.constant 0 : index
    %c0_11 = arith.constant 0 : index
    %15 = vector.load %arg14[%c0_10, %c0_11] : memref<8x32xbf16, #tpu.memory_space<vmem>>, vector<8x8xbf16>
    %c0_12 = arith.constant 0 : index
    %c0_13 = arith.constant 0 : index
    %16 = vector.load %arg15[%c0_12, %c0_13] : memref<8x32xbf16, #tpu.memory_space<vmem>>, vector<8x8xbf16>
    %c0_14 = arith.constant 0 : index
    %c0_15 = arith.constant 0 : index
    %17 = vector.load %arg16[%c0_14, %c0_15] : memref<8x32xbf16, #tpu.memory_space<vmem>>, vector<8x8xbf16>
    %cst_16 = arith.constant dense<0.000000e+00> : vector<8x8xf32>
    %18 = tpu.matmul %15, %16, %cst_16 {dimension_numbers = #tpu.dot_dimension_numbers<[1], [1], [0], [0], [0, 0, 1, 0], [], []>} : vector<8x8xbf16>, vector<8x8xbf16>, vector<8x8xf32> -> vector<8x8xf32>
    %cst_17 = arith.constant dense<0xFF800000> : vector<8xf32>
    %19 = vector.multi_reduction <maximumf>, %18, %cst_17 [1] : vector<8x8xf32> to vector<8xf32>
    %20 = vector.shape_cast %19 : vector<8xf32> to vector<8x1xf32>
    %21 = vector.broadcast %20 : vector<8x1xf32> to vector<8x8xf32>
    %22 = arith.subf %18, %21 : vector<8x8xf32>
    %23 = math.exp %22 : vector<8x8xf32>
    %cst_18 = arith.constant dense<0.000000e+00> : vector<8xf32>
    %24 = vector.multi_reduction <add>, %23, %cst_18 [1] : vector<8x8xf32> to vector<8xf32>
    %25 = vector.shape_cast %24 : vector<8xf32> to vector<8x1xf32>
    %26 = tpu.reciprocal %25 {approx = true} : vector<8x1xf32> -> vector<8x1xf32>
    %27 = vector.broadcast %26 : vector<8x1xf32> to vector<8x8xf32>
    %28 = arith.mulf %23, %27 : vector<8x8xf32>
    %29 = arith.truncf %28 : vector<8x8xf32> to vector<8x8xbf16>
    %cst_19 = arith.constant dense<0.000000e+00> : vector<8x8xf32>
    %30 = tpu.matmul %29, %17, %cst_19 {dimension_numbers = #tpu.dot_dimension_numbers<[1], [0], [0], [1], [0, 0, 1, 1], [], []>} : vector<8x8xbf16>, vector<8x8xbf16>, vector<8x8xf32> -> vector<8x8xf32>
    %c0_20 = arith.constant 0 : index
    %c0_21 = arith.constant 0 : index
    %31 = vector.load %arg17[%c0_20, %c0_21] : memref<8x32xf32, #tpu.memory_space<vmem>>, vector<8x8xf32>
    tpu.vector_store %arg17[%c0_20, %c0_21], %30 {strides = array<i32>} : memref<8x32xf32, #tpu.memory_space<vmem>>, vector<8x8xf32>,
    %c0_22 = arith.constant 0 : index
    %c8 = arith.constant 8 : index
    %32 = vector.load %arg14[%c0_22, %c8] : memref<8x32xbf16, #tpu.memory_space<vmem>>, vector<8x8xbf16>
    %c0_23 = arith.constant 0 : index
    %c8_24 = arith.constant 8 : index
    %33 = vector.load %arg15[%c0_23, %c8_24] : memref<8x32xbf16, #tpu.memory_space<vmem>>, vector<8x8xbf16>
    %c0_25 = arith.constant 0 : index
    %c8_26 = arith.constant 8 : index
    %34 = vector.load %arg16[%c0_25, %c8_26] : memref<8x32xbf16, #tpu.memory_space<vmem>>, vector<8x8xbf16>
    %cst_27 = arith.constant dense<0.000000e+00> : vector<8x8xf32>
    %35 = tpu.matmul %32, %33, %cst_27 {dimension_numbers = #tpu.dot_dimension_numbers<[1], [1], [0], [0], [0, 0, 1, 0], [], []>} : vector<8x8xbf16>, vector<8x8xbf16>, vector<8x8xf32> -> vector<8x8xf32>
    %cst_28 = arith.constant dense<0xFF800000> : vector<8xf32>
    %36 = vector.multi_reduction <maximumf>, %35, %cst_28 [1] : vector<8x8xf32> to vector<8xf32>
    %37 = vector.shape_cast %36 : vector<8xf32> to vector<8x1xf32>
    %38 = vector.broadcast %37 : vector<8x1xf32> to vector<8x8xf32>
    %39 = arith.subf %35, %38 : vector<8x8xf32>
    %40 = math.exp %39 : vector<8x8xf32>
    %cst_29 = arith.constant dense<0.000000e+00> : vector<8xf32>
    %41 = vector.multi_reduction <add>, %40, %cst_29 [1] : vector<8x8xf32> to vector<8xf32>
    %42 = vector.shape_cast %41 : vector<8xf32> to vector<8x1xf32>
    %43 = tpu.reciprocal %42 {approx = true} : vector<8x1xf32> -> vector<8x1xf32>
    %44 = vector.broadcast %43 : vector<8x1xf32> to vector<8x8xf32>
    %45 = arith.mulf %40, %44 : vector<8x8xf32>
    %46 = arith.truncf %45 : vector<8x8xf32> to vector<8x8xbf16>
    %cst_30 = arith.constant dense<0.000000e+00> : vector<8x8xf32>
    %47 = tpu.matmul %46, %34, %cst_30 {dimension_numbers = #tpu.dot_dimension_numbers<[1], [0], [0], [1], [0, 0, 1, 1], [], []>} : vector<8x8xbf16>, vector<8x8xbf16>, vector<8x8xf32> -> vector<8x8xf32>
    %c0_31 = arith.constant 0 : index
    %c8_32 = arith.constant 8 : index
    %48 = vector.load %arg17[%c0_31, %c8_32] : memref<8x32xf32, #tpu.memory_space<vmem>>, vector<8x8xf32>
    tpu.vector_store %arg17[%c0_31, %c8_32], %47 {strides = array<i32>} : memref<8x32xf32, #tpu.memory_space<vmem>>, vector<8x8xf32>,
    %c0_33 = arith.constant 0 : index
    %c16 = arith.constant 16 : index
    %49 = vector.load %arg14[%c0_33, %c16] : memref<8x32xbf16, #tpu.memory_space<vmem>>, vector<8x8xbf16>
    %c0_34 = arith.constant 0 : index
    %c16_35 = arith.constant 16 : index
    %50 = vector.load %arg15[%c0_34, %c16_35] : memref<8x32xbf16, #tpu.memory_space<vmem>>, vector<8x8xbf16>
    %c0_36 = arith.constant 0 : index
    %c16_37 = arith.constant 16 : index
    %51 = vector.load %arg16[%c0_36, %c16_37] : memref<8x32xbf16, #tpu.memory_space<vmem>>, vector<8x8xbf16>
    %cst_38 = arith.constant dense<0.000000e+00> : vector<8x8xf32>
    %52 = tpu.matmul %49, %50, %cst_38 {dimension_numbers = #tpu.dot_dimension_numbers<[1], [1], [0], [0], [0, 0, 1, 0], [], []>} : vector<8x8xbf16>, vector<8x8xbf16>, vector<8x8xf32> -> vector<8x8xf32>
    %cst_39 = arith.constant dense<0xFF800000> : vector<8xf32>
    %53 = vector.multi_reduction <maximumf>, %52, %cst_39 [1] : vector<8x8xf32> to vector<8xf32>
    %54 = vector.shape_cast %53 : vector<8xf32> to vector<8x1xf32>
    %55 = vector.broadcast %54 : vector<8x1xf32> to vector<8x8xf32>
    %56 = arith.subf %52, %55 : vector<8x8xf32>
    %57 = math.exp %56 : vector<8x8xf32>
    %cst_40 = arith.constant dense<0.000000e+00> : vector<8xf32>
    %58 = vector.multi_reduction <add>, %57, %cst_40 [1] : vector<8x8xf32> to vector<8xf32>
    %59 = vector.shape_cast %58 : vector<8xf32> to vector<8x1xf32>
    %60 = tpu.reciprocal %59 {approx = true} : vector<8x1xf32> -> vector<8x1xf32>
    %61 = vector.broadcast %60 : vector<8x1xf32> to vector<8x8xf32>
    %62 = arith.mulf %57, %61 : vector<8x8xf32>
    %63 = arith.truncf %62 : vector<8x8xf32> to vector<8x8xbf16>
    %cst_41 = arith.constant dense<0.000000e+00> : vector<8x8xf32>
    %64 = tpu.matmul %63, %51, %cst_41 {dimension_numbers = #tpu.dot_dimension_numbers<[1], [0], [0], [1], [0, 0, 1, 1], [], []>} : vector<8x8xbf16>, vector<8x8xbf16>, vector<8x8xf32> -> vector<8x8xf32>
    %c0_42 = arith.constant 0 : index
    %c16_43 = arith.constant 16 : index
    %65 = vector.load %arg17[%c0_42, %c16_43] : memref<8x32xf32, #tpu.memory_space<vmem>>, vector<8x8xf32>
    tpu.vector_store %arg17[%c0_42, %c16_43], %64 {strides = array<i32>} : memref<8x32xf32, #tpu.memory_space<vmem>>, vector<8x8xf32>,
    %c0_44 = arith.constant 0 : index
    %c24 = arith.constant 24 : index
    %66 = vector.load %arg14[%c0_44, %c24] : memref<8x32xbf16, #tpu.memory_space<vmem>>, vector<8x8xbf16>
    %c0_45 = arith.constant 0 : index
    %c24_46 = arith.constant 24 : index
    %67 = vector.load %arg15[%c0_45, %c24_46] : memref<8x32xbf16, #tpu.memory_space<vmem>>, vector<8x8xbf16>
    %c0_47 = arith.constant 0 : index
    %c24_48 = arith.constant 24 : index
    %68 = vector.load %arg16[%c0_47, %c24_48] : memref<8x32xbf16, #tpu.memory_space<vmem>>, vector<8x8xbf16>
    %cst_49 = arith.constant dense<0.000000e+00> : vector<8x8xf32>
    %69 = tpu.matmul %66, %67, %cst_49 {dimension_numbers = #tpu.dot_dimension_numbers<[1], [1], [0], [0], [0, 0, 1, 0], [], []>} : vector<8x8xbf16>, vector<8x8xbf16>, vector<8x8xf32> -> vector<8x8xf32>
    %cst_50 = arith.constant dense<0xFF800000> : vector<8xf32>
    %70 = vector.multi_reduction <maximumf>, %69, %cst_50 [1] : vector<8x8xf32> to vector<8xf32>
    %71 = vector.shape_cast %70 : vector<8xf32> to vector<8x1xf32>
    %72 = vector.broadcast %71 : vector<8x1xf32> to vector<8x8xf32>
    %73 = arith.subf %69, %72 : vector<8x8xf32>
    %74 = math.exp %73 : vector<8x8xf32>
    %cst_51 = arith.constant dense<0.000000e+00> : vector<8xf32>
    %75 = vector.multi_reduction <add>, %74, %cst_51 [1] : vector<8x8xf32> to vector<8xf32>
    %76 = vector.shape_cast %75 : vector<8xf32> to vector<8x1xf32>
    %77 = tpu.reciprocal %76 {approx = true} : vector<8x1xf32> -> vector<8x1xf32>
    %78 = vector.broadcast %77 : vector<8x1xf32> to vector<8x8xf32>
    %79 = arith.mulf %74, %78 : vector<8x8xf32>
    %80 = arith.truncf %79 : vector<8x8xf32> to vector<8x8xbf16>
    %cst_52 = arith.constant dense<0.000000e+00> : vector<8x8xf32>
    %81 = tpu.matmul %80, %68, %cst_52 {dimension_numbers = #tpu.dot_dimension_numbers<[1], [0], [0], [1], [0, 0, 1, 1], [], []>} : vector<8x8xbf16>, vector<8x8xbf16>, vector<8x8xf32> -> vector<8x8xf32>
    %c0_53 = arith.constant 0 : index
    %c24_54 = arith.constant 24 : index
    %82 = vector.load %arg17[%c0_53, %c24_54] : memref<8x32xf32, #tpu.memory_space<vmem>>, vector<8x8xf32>
    tpu.vector_store %arg17[%c0_53, %c24_54], %81 {strides = array<i32>} : memref<8x32xf32, #tpu.memory_space<vmem>>, vector<8x8xf32>,
    %c0_55 = arith.constant 0 : index
    %c0_56 = arith.constant 0 : index
    %83 = vector.load %arg17[%c0_55, %c0_56] : memref<8x32xf32, #tpu.memory_space<vmem>>, vector<8x32xf32>
    %84 = arith.truncf %83 : vector<8x32xf32> to vector<8x32xbf16>
    %c0_57 = arith.constant 0 : index
    %c0_58 = arith.constant 0 : index
    %85 = vector.load %arg11[%c0_57, %c0_58] : memref<32x32xbf16, #tpu.memory_space<vmem>>, vector<32x32xbf16>
    %cst_59 = arith.constant dense<0.000000e+00> : vector<8x32xf32>
    %86 = tpu.matmul %84, %85, %cst_59 {dimension_numbers = #tpu.dot_dimension_numbers<[1], [0], [0], [1], [0, 0, 1, 1], [], []>} : vector<8x32xbf16>, vector<32x32xbf16>, vector<8x32xf32> -> vector<8x32xf32>
    %c0_60 = arith.constant 0 : index
    %c0_61 = arith.constant 0 : index
    %87 = vector.load %arg12[%c0_60, %c0_61] : memref<1x32xf32, #tpu.memory_space<vmem>>, vector<1x32xf32>
    %88 = vector.broadcast %87 : vector<1x32xf32> to vector<8x32xf32>
    %89 = arith.addf %86, %88 : vector<8x32xf32>
    %c0_62 = arith.constant 0 : index
    %c0_63 = arith.constant 0 : index
    %c0_64 = arith.constant 0 : index
    %90 = vector.load %arg13[%c0_62, %c0_63, %c0_64] : memref<1x8x32xf32, #tpu.memory_space<vmem>>, vector<1x8x32xf32>
    %91 = vector.shape_cast %90 : vector<1x8x32xf32> to vector<8x32xf32>
    %92 = vector.shape_cast %89 : vector<8x32xf32> to vector<1x8x32xf32>
    tpu.vector_store %arg13[%c0_62, %c0_63, %c0_64], %92 {strides = array<i32>} : memref<1x8x32xf32, #tpu.memory_space<vmem>>, vector<1x8x32xf32>,
    return
  }
  func.func @transform_0(%arg0: i32, %arg1: i32) -> (i32, i32, i32) {
    %c0_i32 = arith.constant 0 : i32
    %c0_i32_0 = arith.constant 0 : i32
    return %arg0, %arg1, %c0_i32 : i32, i32, i32
  }
  func.func @transform_1(%arg0: i32, %arg1: i32) -> (i32, i32, i32) {
    %c0_i32 = arith.constant 0 : i32
    %c0_i32_0 = arith.constant 0 : i32
    %c0_i32_1 = arith.constant 0 : i32
    return %arg0, %c0_i32, %c0_i32_0 : i32, i32, i32
  }
  func.func @transform_2(%arg0: i32, %arg1: i32) -> (i32, i32, i32) {
    %c0_i32 = arith.constant 0 : i32
    %c0_i32_0 = arith.constant 0 : i32
    %c0_i32_1 = arith.constant 0 : i32
    return %arg0, %c0_i32, %c0_i32_0 : i32, i32, i32
  }
  func.func @transform_3(%arg0: i32, %arg1: i32) -> (i32, i32) {
    %c0_i32 = arith.constant 0 : i32
    %c0_i32_0 = arith.constant 0 : i32
    %c0_i32_1 = arith.constant 0 : i32
    return %c0_i32, %c0_i32_0 : i32, i32
  }
  func.func @transform_4(%arg0: i32, %arg1: i32) -> (i32, i32) {
    %c0_i32 = arith.constant 0 : i32
    %c0_i32_0 = arith.constant 0 : i32
    %c0_i32_1 = arith.constant 0 : i32
    return %c0_i32, %c0_i32_0 : i32, i32
  }
  func.func @transform_5(%arg0: i32, %arg1: i32) -> (i32, i32) {
    %c0_i32 = arith.constant 0 : i32
    %c0_i32_0 = arith.constant 0 : i32
    %c0_i32_1 = arith.constant 0 : i32
    return %c0_i32, %c0_i32_0 : i32, i32
  }
  func.func @transform_6(%arg0: i32, %arg1: i32) -> (i32, i32) {
    %c0_i32 = arith.constant 0 : i32
    %c0_i32_0 = arith.constant 0 : i32
    %c0_i32_1 = arith.constant 0 : i32
    return %c0_i32, %c0_i32_0 : i32, i32
  }
  func.func @transform_7(%arg0: i32, %arg1: i32) -> (i32, i32) {
    %c0_i32 = arith.constant 0 : i32
    %c0_i32_0 = arith.constant 0 : i32
    %c0_i32_1 = arith.constant 0 : i32
    return %c0_i32, %c0_i32_0 : i32, i32
  }
  func.func @transform_8(%arg0: i32, %arg1: i32) -> (i32, i32) {
    %c0_i32 = arith.constant 0 : i32
    %c0_i32_0 = arith.constant 0 : i32
    %c0_i32_1 = arith.constant 0 : i32
    return %c0_i32, %c0_i32_0 : i32, i32
  }
  func.func @transform_9(%arg0: i32, %arg1: i32) -> (i32, i32) {
    %c0_i32 = arith.constant 0 : i32
    %c0_i32_0 = arith.constant 0 : i32
    %c0_i32_1 = arith.constant 0 : i32
    return %c0_i32, %c0_i32_0 : i32, i32
  }
  func.func @transform_10(%arg0: i32, %arg1: i32) -> (i32, i32) {
    %c0_i32 = arith.constant 0 : i32
    %c0_i32_0 = arith.constant 0 : i32
    %c0_i32_1 = arith.constant 0 : i32
    return %c0_i32, %c0_i32_0 : i32, i32
  }
  func.func @transform_11(%arg0: i32, %arg1: i32) -> (i32, i32, i32) {
    %c0_i32 = arith.constant 0 : i32
    %c0_i32_0 = arith.constant 0 : i32
    return %arg0, %arg1, %c0_i32 : i32, i32, i32
  }
}

</mosaic_0001>

<bundles_post_ra>
// kernel: tpu_custom_call.1
= control target key start
LH: loop header
LB: loop body
LE: loop exit
PB: predicated region body
PF: predicated region fallthrough
CT: control target
= control target key end

     0   :  { %s2063_s0 = inlined_call_operand.hbm [shape: f32[2,8,32], index: 0, kind: input, shape index: {}]   ;;  %s2064_s1 = inlined_call_operand.hbm [shape: f32[2,8,32], index: 1, kind: input, shape index: {}]   ;;  %s2065_s2 = inlined_call_operand.hbm [shape: f32[2,8,32], index: 2, kind: input, shape index: {}]   ;;  %s2066_s3 = inlined_call_operand.hbm [shape: bf16[32,32], index: 3, kind: input, shape index: {}]   ;;  %s2067_s4 = inlined_call_operand.vmem [shape: f32[1,32], index: 4, kind: input, shape index: {}]   ;;  %s2068_s5 = inlined_call_operand.hbm [shape: bf16[32,32], index: 5, kind: input, shape index: {}]   ;;  %s2069_s6 = inlined_call_operand.vmem [shape: f32[1,32], index: 6, kind: input, shape index: {}]   ;;  %s2070_s7 = inlined_call_operand.hbm [shape: bf16[32,32], index: 7, kind: input, shape index: {}]   ;;  %s2071_s8 = inlined_call_operand.vmem [shape: f32[1,32], index: 8, kind: input, shape index: {}]   ;;  %s2072_s9 = inlined_call_operand.hbm [shape: bf16[32,32], index: 9, kind: input, shape index: {}]   ;;  %s2073_s10 = inlined_call_operand.vmem [shape: f32[1,32], index: 10, kind: input, shape index: {}]   ;;  %s2074_s11 = inlined_call_operand.hbm [shape: f32[2,8,32], index: 11, kind: output, shape index: {}]  }
   0x1   :  { %2088 = sst [smem:[#allocation31_spill]] %s2063_s0 }
   0x2   :  { %2089 = sst [smem:[#allocation32_spill]] %s2064_s1 }
   0x3   :  { %2090 = sst [smem:[#allocation33_spill]] %s2066_s3 }
   0x4   :  { %2091 = sst [smem:[#allocation34_spill]] %s2068_s5 }
   0x5   :  { %2092 = sst [smem:[#allocation35_spill]] %s2070_s7 }
   0x6   :  { %2093 = sst [smem:[#allocation36_spill]] %s2072_s9 }
   0x7   :  { %2094 = sst [smem:[#allocation37_spill]] %s2073_s10 }
   0x8   :  { %16 = vsyncpa [#allocation7], 0 }
   0x9   :  { %18 = vsyncpa [#allocation7 + $0x1], 0 }
   0xa   :  { %19 = vsyncpa [#allocation10], 0 }
   0xb   :  { %21 = vsyncpa [#allocation10 + $0x1], 0 }
   0xc   :  { %22 = vsyncpa [#allocation13], 0 }
   0xd   :  { %23 = vsyncpa [#allocation16], 0 }
   0xe   :  { %24 = vsyncpa [#allocation8], 0 }
   0xf   :  { %26 = vsyncpa [#allocation8 + $0x1], 0  ;;  %s1785_s17 = smov 0   ;;  %s1787_s18 = smov 0  }
  0x10   :  { %s1789_s19 = smov 0   ;;  %s1791_s20 = smov 0  }
  0x11   :  { %s1793_s21 = smov 0   ;;  %s1795_s22 = smov 0  }
  0x12 LB: > { %2095 = sst [smem:[#allocation24_spill]] %s1691_s17  ;;  %s1816_s23 = sadd.s32 4294967295, %s1711_s22   ;;  %s1711_s22 = sphi %s1795_s22, %s32_s22   ;;  %s1707_s21 = sphi %s1793_s21, %s2129_s21   ;;  %s1703_s20 = sphi %s1791_s20, %s2124_s20   ;;  %s1699_s19 = sphi %s1789_s19, %s2128_s19   ;;  %s1695_s18 = sphi %s1787_s18, %s2127_s18   ;;  %s1691_s17 = sphi %s1785_s17, %s2126_s17  }
  0x13   : > { %2096 = sst [smem:[#allocation25_spill]] %s1707_s21  ;;  %p1189_p0 = scmp.ge.s32.totalorder %s1711_s22, 1 }
  0x14   : > { %2097 = sst [smem:[#allocation26_spill]] %s1711_s22  ;;  %p67_p1 = scmp.eq.s32.totalorder %s1816_s23, 0 }
  0x15   : > { %p325_p2 = scmp.lt.s32.totalorder %s1711_s22, 3  ;;  %s2098_s3 = sld [smem:[#allocation33_spill]] }
  0x16   : > { %s1713_s28 = smov [#allocation12]   ;;  %p1194_p6 = scmp.ge.s32.totalorder %s1711_s22, 2 }
  0x17   : > { %p1824_p3 = pnand %p1189_p0, %p325_p2  ;;  %s338_s29 = sshll.u32 %s1713_s28, 4  ;;  %s339_s29 = int_to_ptr.vmem [resolvable:$true] %s338_s29 }
  0x18   : > { %s2101_s7 = sld [smem:[#allocation35_spill]]  ;;  %s2075_s15 = smov 64  }
  0x19   : > { %p1290_p4 = pneg %p1824_p3  ;;  %s2077_s16 = smov 4  }
  0x1a   : > { %s1716_s24 = smov [#allocation15]   ;;  %s1188_s28 = sadd.s32 4294967294, %s1711_s22  }
  0x1b   : > { %s336_s26 = sshll.u32 %s2098_s3, 4  ;;  %p1832_p5 = pnand %p1290_p4, %p67_p1  ;;  %s337_s26 = int_to_ptr.hbm [resolvable:$true] %s336_s26 }
  0x1c   : > { %s372_s25 = sshll.u32 %s1716_s24, 4  ;;  %s44_s12 = sadd.s32 1, %s1707_s21  ;;  %s373_s25 = int_to_ptr.vmem [resolvable:$true] %s372_s25 }
  0x1d   : > { %1293 = dma.hbm_to_vmem [thread:$0]  (!%p1832_p5), %s337_s26, 256, %s339_s29, [#allocation13], %s2075_s15, %s2075_s15, %s2077_s16  }
  0x1e   : > { %s370_s14 = sshll.u32 %s2101_s7, 4  ;;  %p46_p7 = scmp.ge.s32.totalorder %s44_s12, 2  ;;  %s371_s14 = int_to_ptr.hbm [resolvable:$true] %s370_s14 }
  0x1f   : > { %1299 = dma.hbm_to_vmem [thread:$0]  (!%p1832_p5), %s371_s14, 256, %s373_s25, [#allocation16], %s2075_s15, %s2075_s15, %s2077_s16  }
  0x20   : > { %s53_s13 = sadd.s32 1, %s1699_s19  ;;  %p60_p8 = scmp.ne.s32.totalorder %s1699_s19, %s1695_s18 }
  0x21   : > { %p61_p9 = scmp.eq.s32.totalorder %s1711_s22, 0  ;;  %s2131_s12 = smov (%p46_p7, %s44_s12), 0 }
  0x22   : > { %2102 = sst [smem:[#allocation27_spill]] %s2131_s12  ;;  %p66_p11 = scmp.ne.s32.totalorder %s1695_s18, %s1691_s17 }
  0x23   : > { %p1858_p10 = por %p61_p9, %p60_p8  ;;  %s48_s29 = ssub.s32 %s1707_s21, %s2131_s12 }
  0x24   : > { %p312_p12 = scmp.eq.s32.totalorder %s1816_s23, 1  ;;  %p51_p13 = scmp.eq.s32.totalorder %s48_s29, 0 }
  0x25   : > { %p1869_p0 = por %p67_p1, %p66_p11  ;;  %p318_p4 = scmp.eq.s32.totalorder %s1188_s28, 1 }
  0x26   : > { %p1873_p2 = por %p312_p12, %p60_p8  ;;  %p1321_p9 = scmp.lt.s32.totalorder %s1711_s22, 2 }
  0x27   : > { %s1878_s25 = scalar_select %p51_p13, %s1699_s19, %s53_s13  }
  0x28   : > { %s2105_s24 = scalar_select %p1873_p2, 1, 0 }
  0x29   : > { %2107 = sst [smem:[#allocation29_spill]] %s1878_s25  ;;  %p1880_p7 = por %p318_p4, %p66_p11 }
  0x2a   : > { %2106 = sst [smem:[#allocation28_spill]] %s2105_s24  ;;  %s2083_s16 = sand.u32 1, %s1699_s19  }
  0x2b   : > { %s2108_s15 = scalar_select %p1880_p7, 1, 0 }
  0x2c   : > { %s1887_s3 = sshll.u32 %s1707_s21, 3  ;;  %s1891_s29 = sshll.u32 %s2083_s16, 3 }
  0x2d   : > { %2109 = sst [smem:[#allocation30_spill]] %s2108_s15  ;;  %p1895_p8 = pnand %p1321_p9, %p1858_p10 }
  0x2e   : > { %s426_s28 = sand.u32 1, %s1711_s22   ;;  %s2111_s1 = sld [smem:[#allocation32_spill]] }
  0x2f   : > { %s430_s15 = scalar_lea.vmem [#allocation9], %s1891_s29  ;;  %s2112_s5 = sld [smem:[#allocation34_spill]] }
  0x30   : > { %s438_s21 = sshll.u32 %s430_s15, 4  ;;  %s427_s24 = scalar_lea.sflag [#allocation10], %s426_s28  ;;  %s439_s21 = int_to_ptr.vmem [resolvable:$true] %s438_s21 }
  0x31   : > { %s1717_s22 = smov [#allocation14]   ;;  %s2113_s9 = sld [smem:[#allocation36_spill]] }
  0x32   : > { %s355_s12 = sshll.u32 %s1717_s22, 4  ;;  %s2115_s16 = smov 64   ;;  %s356_s12 = int_to_ptr.vmem [resolvable:$true] %s355_s12 }
  0x33   : > { %s1718_s28 = smov [#allocation17]   ;;  %s2116_s0 = sld [smem:[#allocation31_spill]] }
  0x34   : > { %s434_s25 = scalar_lea.hbm %s2111_s1, %s1887_s3  ;;  %s410_s13 = scalar_lea.vmem [#allocation6], %s1891_s29 }
  0x35   : > { %s436_s17 = sshll.u32 %s434_s25, 4  ;;  %s353_s10 = sshll.u32 %s2112_s5, 4  ;;  %s437_s17 = int_to_ptr.hbm [resolvable:$true] %s436_s17  ;;  %s354_s10 = int_to_ptr.hbm [resolvable:$true] %s353_s10 }
  0x36   : > { %1309 = dma.hbm_to_vmem [thread:$0]  (!%p1895_p8), %s437_s17, 128, %s439_s21, %s427_s24  }
  0x37   : > { %s387_s15 = sshll.u32 %s2113_s9, 4  ;;  %s2114_s25 = smov 4   ;;  %s388_s15 = int_to_ptr.hbm [resolvable:$true] %s387_s15 }
  0x38   : > { %1296 = dma.hbm_to_vmem [thread:$0]  (!%p1832_p5), %s354_s10, 256, %s356_s12, [#allocation13], %s2115_s16, %s2115_s16, %s2114_s25  }
  0x39   : > { %s389_s17 = sshll.u32 %s1718_s28, 4  ;;  %s415_s22 = scalar_lea.hbm %s2116_s0, %s1887_s3  ;;  %s390_s17 = int_to_ptr.vmem [resolvable:$true] %s389_s17 }
  0x3a   : > { %1302 = dma.hbm_to_vmem [thread:$0]  (!%p1832_p5), %s388_s15, 256, %s390_s17, [#allocation16], %s2115_s16, %s2115_s16, %s2114_s25  }
  0x3b   : > { %s417_s1 = sshll.u32 %s415_s22, 4  ;;  %s419_s5 = sshll.u32 %s410_s13, 4  ;;  %s418_s1 = int_to_ptr.hbm [resolvable:$true] %s417_s1  ;;  %s420_s5 = int_to_ptr.vmem [resolvable:$true] %s419_s5 }
  0x3c   : > { %s2117_s9 = sand.u32 1, %s1699_s19   ;;  %s453_s21 = scalar_lea.hbm %s2065_s2, %s1887_s3 }
  0x3d   : > { %s407_s10 = scalar_lea.sflag [#allocation7], %s2117_s9  ;;  %s455_s26 = sshll.u32 %s453_s21, 4  ;;  %s456_s26 = int_to_ptr.hbm [resolvable:$true] %s455_s26 }
  0x3e   : > { %1306 = dma.hbm_to_vmem [thread:$0]  (!%p1895_p8), %s418_s1, 128, %s420_s5, %s407_s10  }
  0x3f   : > { %s449_s0 = scalar_lea.vmem [#allocation11], %s1891_s29  ;;  %466 = sbr.rel (%p1824_p3) target bundleno = 1166 (0x48e), region = 64 }
  0x40   : > { %s457_s30 = sshll.u32 %s449_s0, 4  ;;  %s1942_s15 = sand.u32 (!%p1824_p3), 1, %s1695_s18   ;;  %s458_s30 = int_to_ptr.vmem [resolvable:$true] %s457_s30 }
  0x41   : > { %1312 = dma.hbm_to_vmem [thread:$0]  (!%p1895_p8), %s456_s26, 128, %s458_s30, %s427_s24  }
  0x42   : > { %s1945_s5 = sshll.u32 (!%p1824_p3), %s1942_s15, 3  ;;  %s469_s3 = scalar_lea.sflag (!%p1824_p3), [#allocation7], %s1942_s15 }
  0x43   : > { %s472_s9 = scalar_lea.vmem (!%p1824_p3), [#allocation6], %s1945_s5 }
  0x44   : > { %1670 = dma.done.wait (%p1869_p0), %s469_s3, 128  }
  0x45   : > { %1672 = vsyncadd (%p1869_p0), %s469_s3, 4294967168  ;;  %s478_s0 = sand.u32 1, %s1816_s23   ;;  %s482_s27 = scalar_lea.vmem [#allocation9], %s1945_s5 }
  0x46   : > { %s479_s7 = scalar_lea.sflag [#allocation10], %s478_s0 }
  0x47   : > { %1674 = dma.done.wait (%p1869_p0), %s479_s7, 256  }
  0x48   : > { %1676 = vsyncadd (%p1869_p0), %s479_s7, 4294967040  ;;  %s492_s24 = scalar_lea.vmem [#allocation11], %s1945_s5 }
  0x49   : > { %1678 = dma.done.wait (%p67_p1), [#allocation13], 512  }
  0x4a   : > { %1680 = vsyncadd (%p67_p1), [#allocation13], 4294966784 }
  0x4b   : > { %1682 = dma.done.wait (%p67_p1), [#allocation16], 512  }
  0x4c   : > { %1684 = vsyncadd (%p67_p1), [#allocation16], 4294966784  ;;  %v1259_v0 = vld [vmem:[#allocation14 + $0x8] sm:$0xff]  ;;  %v1263_v1 = vld [vmem:[#allocation12 + $0x8] sm:$0xff]  ;;  %vm591_vm0 = vcmask 261120   ;;  %vm645_vm1 = vcmask 257024  }
  0x4d   : > { %v1258_v2 = vld [vmem:[#allocation14] sm:$0xff]  ;;  %v1262_v3 = vld [vmem:[#allocation12] sm:$0xff]  ;;  %601 = vmatpush.bf16.msra.mxu0 %v1259_v0  ;;  %681 = vmatpush.bf16.msra.mxu2 %v1263_v1  ;;  %v1387_v8 = vld [vmem:[%s2069_s6] ss:$0 sm:$0xff]  ;;  %vm695_vm2 = vcmask 64512   ;;  %s1719_s16 = smov 112  }
  0x4e   : > { %v567_v4 = vld [vmem:[%s482_s27] sm:$0xff]  ;;  %v649_v5 = vld [vmem:[%s472_s9] sm:$0xff]  ;;  %s1720_s17 = smov 120   ;;  %s1721_s22 = smov 104   ;;  %vm730_vm3 = vcmask 1043456   ;;  %vm820_vm4 = vcmask 130112  }
  0x4f   : > { %v568_v6 = vpack.c.bf16 %v567_v4, %v567_v4  ;;  %v650_v7 = vpack.c.bf16 %v649_v5, %v649_v5  ;;  %v1261_v11 = vld [vmem:[#allocation15 + $0x8] sm:$0xff]  ;;  %v1388_v13 = vld [vmem:[%s2067_s4] ss:$0 sm:$0xff]  ;;  %v1260_v14 = vld [vmem:[#allocation15] sm:$0xff]  ;;  %s1722_s10 = smov 8   ;;  %s1723_s12 = smov 24  }
  0x50   : > { %637 = vmatpush.bf16.msra.mxu1 %v1261_v11  ;;  %v569_v42 = vld [vmem:[%s492_s24] sm:$0xff]  ;;  %s1724_s28 = smov 16   ;;  %vm894_vm5 = vcmask 195712   ;;  %vm968_vm6 = vcmask 261312   ;;  %s1255_s21 = sshll.u32 %s1703_s20, 3 }
  0x51   : > { %602 = vmatpush.bf16.msra.mxu0 %v1258_v2  ;;  %682 = vmatpush.bf16.msra.mxu2 %v1262_v3  ;;  %v570_v43 = vpack.c.bf16 %v569_v42, %v569_v42  ;;  %v1389_v56 = vld [vmem:[%s2071_s8] ss:$0 sm:$0xff]  ;;  %s1021_s9 = scalar_lea.hbm %s2074_s11, %s1255_s21  ;;  %s2119_s27 = sld [smem:[#allocation37_spill]] }
  0x52   : > { %s561_s24 = scalar_lea.vmem [#allocation18], %s1945_s5  ;;  %s1025_s23 = sshll.u32 %s1021_s9, 4  ;;  %s1026_s23 = int_to_ptr.hbm [resolvable:$true] %s1025_s23 }
  0x53   : > { %s1023_s14 = sshll.u32 %s561_s24, 4  ;;  %s1010_s29 = scalar_lea.sflag [#allocation8], %s1942_s15  ;;  %s1024_s14 = int_to_ptr.vmem [resolvable:$true] %s1023_s14 }
  0x54   : > { %1218 = vmatmul.msk.bf16.vlgmr.msra.gmra.mxu0 %vm591_vm0, %v568_v6  ;;  %1236 = vmatmul.msk.bf16.vlgmr.msra.gmra.mxu2 %vm591_vm0, %v650_v7  ;;  %s1631_s20 = sshra.s32 %s1026_s23, 4  ;;  %s1637_s5 = scalar_lea.hbm %s2074_s11, 16  ;;  %s1632_s20 = int_to_ptr.hbm [resolvable:$true] %s1631_s20 }
  0x55   : > { %638 = vmatpush.bf16.msra.mxu1 %v1260_v14  ;;  %s1633_s25 = scalar_lea.hbm %s1632_s20, 8  ;;  %p1638_p10 = scmp.lt.s32.totalorder %s1632_s20, %s2074_s11 }
  0x56   : > { %p1634_p1 = scmp.ne.s32.totalorder %s1632_s20, %s1633_s25  ;;  %p1639_p11 = scmp.lt.s32.totalorder %s1637_s5, %s1633_s25 }
  0x58   : > { %1227 = vmatmul.msk.bf16.vlgmr.msra.gmra.mxu1 %vm591_vm0, %v570_v43  ;;  %p1635_p3 = pnand %p1634_p1, %p1873_p2  ;;  %p1640_p12 = por %p1639_p11, %p1638_p10 }
  0x5a   : > { %p1636_p5 = pneg %p1635_p3 }
  0x5c   : > { %p1641_p13 = pnand %p1640_p12, %p1636_p5 }
  0xd1   : > { %v604_v9 = vpop.f32.mrf.mxu0 }
  0xd2   : > { %v605_v10 = vadd.f32 %v1387_v8, %v604_v9 }
  0xd4   : > { %v644_v12 = vpack.c.bf16 %v605_v10, %v605_v10 }
  0xd5   : > { %v640_v57 = vpop.f32.mrf.mxu1 }
  0xd6   : > { %646 = vst.msk [vmem:[#allocation3] sm:$0xf] %vm645_vm1, %v644_v12  ;;  %v641_v58 = vadd.f32 %v1389_v56, %v640_v57 }
  0xd7   : > { %v684_v15 = vpop.f32.mrf.mxu2 }
  0xd8   : > { %v685_v16 = vadd.f32 %v1388_v13, %v684_v15  ;;  %v647_v59 = vpack.c.bf16 %v641_v58, %v641_v58 }
  0xd9   : > { %v606_v17 = vpop.f32.mrf.mxu0 }
  0xda   : > { %v688_v18 = vmul.f32 0.125, %v685_v16  ;;  %648 = vst.msk [vmem:[#allocation4] sm:$0xf] %vm645_vm1, %v647_v59 }
  0xdc   : > { %v689_v19 = vpack.c.bf16 %v688_v18, %v688_v18 }
  0xdd   : > { %v693_v20 = vld [vmem:[#allocation3] sm:$0xf]  ;;  %v642_v60 = vpop.f32.mrf.mxu1 }
  0xde   : > { %v823_v21 = vld [vmem:[#allocation3] sm:$0xf]  ;;  %691 = vst.msk [vmem:[#allocation2] sm:$0xf] %vm645_vm1, %v689_v19  ;;  %v700_v23 = vsel %vm695_vm2, %v693_v20, 0 }
  0xdf   : > { %v749_v22 = vld [vmem:[#allocation3] sm:$0xf]  ;;  %v831_v24 = vunpack.c.l.b16 %v823_v21  ;;  %v686_v26 = vpop.f32.mrf.mxu2  ;;  %709 = vmatpush.bf16.xpose.msra.mxu3 %v700_v23 }
  0xe0   : > { %v757_v25 = vunpack.c.l.b16 %v749_v22  ;;  %v897_v29 = vld [vmem:[#allocation3] sm:$0xf] }
  0xe1   : > { %v832_v27 = vpack.c.b16 %v831_v24, %v831_v24  ;;  %v905_v30 = vunpack.c.l.b16 %v897_v29  ;;  %v694_v61 = vld [vmem:[#allocation4] sm:$0xf] }
  0xe2   : > { %v758_v28 = vpack.c.b16 %v757_v25, %v757_v25  ;;  %v732_v62 = vsel %vm730_vm3, %v694_v61, 0  ;;  %v750_v13 = vld [vmem:[#allocation4] sm:$0xf] }
  0xe3   : > { %833 = vrot.lane.b32.xlu1 %v832_v27, %s1719_s16  ;;  %v906_v37 = vpack.c.b16 %v905_v30, %v905_v30  ;;  %741 = vmatpush.bf16.msrb.mxu0 %v732_v62  ;;  %v793_v14 = vunpack.c.l.b16 %v750_v13 }
  0xe4   : > { %759 = vrot.lane.b32.xlu0 %v758_v28, %s1720_s17 }
  0xe5   : > { %v692_v31 = vld [vmem:[#allocation2] sm:$0xf]  ;;  %v794_v15 = vpack.c.b16 %v793_v14, %v793_v14 }
  0xe6   : > { %v822_v32 = vld [vmem:[#allocation2] sm:$0xf]  ;;  %1237 = vmatmul.msk.bf16.vlgmr.msra.gmra.mxu3 %vm695_vm2, %v692_v31 }
  0xe7   : > { %v748_v33 = vld [vmem:[#allocation2] sm:$0xf]  ;;  %v826_v34 = vunpack.c.l.b16 %v822_v32 }
  0xe8   : > { %v752_v35 = vunpack.c.l.b16 %v748_v33  ;;  %v896_v39 = vld [vmem:[#allocation2] sm:$0xf] }
  0xe9   : > { %v827_v36 = vpack.c.b16 %v826_v34, %v826_v34  ;;  %v900_v40 = vunpack.c.l.b16 %v896_v39 }
  0xea   : > { %v753_v38 = vpack.c.b16 %v752_v35, %v752_v35 }
  0xeb   : > { %828 = vrot.lane.b32.xlu2 %v827_v36, %s1719_s16  ;;  %907 = vrot.lane.b32.xlu1 %v906_v37, %s1721_s22  ;;  %v901_v41 = vpack.c.b16 %v900_v40, %v900_v40  ;;  %v898_v37 = vld [vmem:[#allocation4] sm:$0xf] }
  0xec   : > { %754 = vrot.lane.b32.xlu0 %v753_v38, %s1720_s17  ;;  %v941_v38 = vunpack.c.l.b16 %v898_v37  ;;  %v824_v40 = vld [vmem:[#allocation4] sm:$0xf] }
  0xee   : > { %v942_v39 = vpack.c.b16 %v941_v38, %v941_v38 }
  0xf3   : > { %902 = vrot.lane.b32.xlu2 %v901_v41, %s1721_s22  ;;  %v867_v41 = vunpack.c.l.b16 %v824_v40 }
  0xf5   : > { %v868_v42 = vpack.c.b16 %v867_v41, %v867_v41 }
 0x145   : > { %v829_v48 = vpop.permute.xlu2 %828 }
 0x14d   : > { %v903_v54 = vpop.permute.xlu2 %902 }
 0x155   : > { %v834_v44 = vpop.permute.xlu1 %833 }
 0x156   : > { %v760_v45 = vpop.permute.xlu0 %759  ;;  %v839_v47 = vsel %vm695_vm2, %v834_v44, 0 }
 0x157   : > { %v765_v46 = vsel %vm695_vm2, %v760_v45, 0  ;;  %848 = vmatpush.bf16.xpose.msrb.mxu3 %v839_v47 }
 0x158   : > { %774 = vmatpush.bf16.xpose.msrb.mxu1 %v765_v46 }
 0x15d   : > { %v908_v49 = vpop.permute.xlu1 %907 }
 0x15e   : > { %v913_v50 = vsel %vm695_vm2, %v908_v49, 0  ;;  %v755_v51 = vpop.permute.xlu0 %754  ;;  %1241 = vmatmul.msk.bf16.vlgmr.msrb.gmra.mxu3 %vm695_vm2, %v829_v48 }
 0x15f   : > { %1239 = vmatmul.msk.bf16.vlgmr.msrb.gmra.mxu1 %vm695_vm2, %v755_v51 }
 0x160   : > { %922 = vmatpush.bf16.xpose.msra.mxu1 %v913_v50 }
 0x169   : > { %v711_v52 = vpop.f32.mrf.mxu3 }
 0x16a   : > { %v715_v53 = vsel %vm695_vm2, %v711_v52, -inf }
 0x16b   : > { %716 = vmax.xlane.f32.xlu1 %v715_v53 }
 0x16f   : > { %1243 = vmatmul.msk.bf16.vlgmr.msra.gmra.mxu1 %vm695_vm2, %v903_v54 }
 0x171   : > { %v713_v55 = vpop.f32.mrf.mxu3 }
 0x1dc   : > { %v776_v63 = vpop.f32.mrf.mxu1 }
 0x1dd   : > { %v780_v0 = vsel %vm695_vm2, %v776_v63, -inf }
 0x1de   : > { %781 = vmax.xlane.f32.xlu0 %v780_v0  ;;  %v717_v1 = vpop.xlane.xlu1 %716 }
 0x1df   : > { %v718_v2 = vsub.f32 %v711_v52, %v717_v1 }
 0x1e1   : > { %v850_v3 = vpop.f32.mrf.mxu3  ;;  %v719_v4 = vmul.f32 1.442695, %v718_v2 }
 0x1e2   : > { %v854_v12 = vsel %vm695_vm2, %v850_v3, -inf }
 0x1e3   : > { %1391 = vpow2.f32 %v719_v4  ;;  %v1265_v4 = vld [vmem:[#allocation17 + $0x8] sm:$0xff] }
 0x1e4   : > { %v778_v5 = vpop.f32.mrf.mxu1  ;;  %1001 = vmatpush.bf16.msra.mxu3 %v1265_v4 }
 0x1e5   : > { %v1264_v5 = vld [vmem:[#allocation17] sm:$0xff] }
 0x1e8   : > { %1002 = vmatpush.bf16.msra.mxu3 %v1264_v5 }
 0x1e9   : > { %v852_v6 = vpop.f32.mrf.mxu3  ;;  %v1392_v7 = vpop.eup %1391 }
 0x1ea   : > { %v721_v8 = vsel %vm695_vm2, %v1392_v7, 0.0 }
 0x1eb   : > { %722 = vadd.xlane.f32.xlu1 %v721_v8 }
 0x1ec   : > { %v924_v9 = vpop.f32.mrf.mxu1 }
 0x1ed   : > { %v928_v10 = vsel %vm695_vm2, %v924_v9, -inf }
 0x1ee   : > { %929 = vmax.xlane.f32.xlu2 %v928_v10  ;;  %v1390_v10 = vld [vmem:[%s2119_s27] ss:$0 sm:$0xff] }
 0x1f4   : > { %v926_v11 = vpop.f32.mrf.mxu1 }
 0x1f6   : > { %855 = vmax.xlane.f32.xlu2 %v854_v12 }
 0x20e   : > { %795 = vrot.lane.b32.xlu2 %v794_v15, %s1720_s17 }
 0x251   : > { %v782_v16 = vpop.xlane.xlu0 %781 }
 0x252   : > { %v783_v17 = vsub.f32 %v776_v63, %v782_v16 }
 0x254   : > { %v784_v18 = vmul.f32 1.442695, %v783_v17 }
 0x256   : > { %1393 = vpow2.f32 %v784_v18 }
 0x25c   : > { %v1394_v19 = vpop.eup %1393 }
 0x25d   : > { %v786_v20 = vsel %vm695_vm2, %v1394_v19, 0.0 }
 0x25e   : > { %787 = vadd.xlane.f32.xlu0 %v786_v20  ;;  %v723_v21 = vpop.xlane.xlu1 %722 }
 0x25f   : > { %1395 = vrcp.f32 %v723_v21 }
 0x261   : > { %v930_v22 = vpop.xlane.xlu2 %929 }
 0x262   : > { %v931_v23 = vsub.f32 %v924_v9, %v930_v22 }
 0x264   : > { %v932_v24 = vmul.f32 1.442695, %v931_v23 }
 0x265   : > { %v1396_v25 = vpop.eup %1395 }
 0x266   : > { %1397 = vpow2.f32 %v932_v24  ;;  %v725_v26 = vmul.f32 %v1396_v25, %v1392_v7 }
 0x268   : > { %v726_v28 = vpack.c.bf16 %v725_v26, %v725_v26 }
 0x269   : > { %v856_v27 = vpop.xlane.xlu2 %855 }
 0x26a   : > { %v857_v29 = vsub.f32 %v850_v3, %v856_v27  ;;  %1238 = vmatmul.msk.bf16.vlgmr.msrb.gmra.mxu0 %vm695_vm2, %v726_v28 }
 0x26c   : > { %v1398_v30 = vpop.eup %1397  ;;  %v858_v31 = vmul.f32 1.442695, %v857_v29 }
 0x26d   : > { %v934_v32 = vsel %vm695_vm2, %v1398_v30, 0.0 }
 0x26e   : > { %1399 = vpow2.f32 %v858_v31  ;;  %935 = vadd.xlane.f32.xlu0 %v934_v32 }
 0x271   : > { %v796_v33 = vpop.permute.xlu2 %795 }
 0x272   : > { %v801_v34 = vsel %vm730_vm3, %v796_v33, 0 }
 0x273   : > { %810 = vmatpush.bf16.msrb.mxu2 %v801_v34 }
 0x274   : > { %v1400_v35 = vpop.eup %1399 }
 0x275   : > { %v860_v36 = vsel %vm695_vm2, %v1400_v35, 0.0 }
 0x276   : > { %861 = vadd.xlane.f32.xlu1 %v860_v36 }
 0x282   : > { %943 = vrot.lane.b32.xlu0 %v942_v39, %s1721_s22 }
 0x28f   : > { %869 = vrot.lane.b32.xlu1 %v868_v42, %s1719_s16 }
 0x2d1   : > { %v788_v43 = vpop.xlane.xlu0 %787 }
 0x2d2   : > { %1401 = vrcp.f32 %v788_v43 }
 0x2d8   : > { %v1402_v44 = vpop.eup %1401 }
 0x2d9   : > { %v790_v45 = vmul.f32 %v1402_v44, %v1394_v19 }
 0x2db   : > { %v791_v46 = vpack.c.bf16 %v790_v45, %v790_v45 }
 0x2dd   : > { %1240 = vmatmul.msk.bf16.vlgmr.msrb.gmra.mxu2 %vm695_vm2, %v791_v46 }
 0x2e1   : > { %v936_v47 = vpop.xlane.xlu0 %935 }
 0x2e2   : > { %1403 = vrcp.f32 %v936_v47 }
 0x2e7   : > { %v743_v48 = vpop.f32.mrf.mxu0 }
 0x2e8   : > { %747 = vst.msk [vmem:[#allocation5] sm:$0xff] %vm695_vm2, %v743_v48  ;;  %v1404_v49 = vpop.eup %1403 }
 0x2e9   : > { %v938_v51 = vmul.f32 %v1404_v49, %v1398_v30  ;;  %v862_v52 = vpop.xlane.xlu1 %861 }
 0x2ea   : > { %1405 = vrcp.f32 %v862_v52 }
 0x2eb   : > { %v939_v55 = vpack.c.bf16 %v938_v51, %v938_v51 }
 0x2ef   : > { %v745_v50 = vpop.f32.mrf.mxu0 }
 0x2f0   : > { %v1406_v56 = vpop.eup %1405 }
 0x2f1   : > { %v864_v57 = vmul.f32 %v1406_v56, %v1400_v35 }
 0x2f3   : > { %v865_v60 = vpack.c.bf16 %v864_v57, %v864_v57 }
 0x2f4   : > { %v944_v53 = vpop.permute.xlu0 %943 }
 0x2f5   : > { %v949_v54 = vsel %vm730_vm3, %v944_v53, 0 }
 0x2f6   : > { %958 = vmatpush.bf16.msra.mxu2 %v949_v54 }
 0x2f9   : > { %1244 = vmatmul.msk.bf16.vlgmr.msra.gmra.mxu2 %vm695_vm2, %v939_v55 }
 0x301   : > { %v870_v58 = vpop.permute.xlu1 %869 }
 0x302   : > { %v875_v59 = vsel %vm730_vm3, %v870_v58, 0 }
 0x303   : > { %884 = vmatpush.bf16.msra.mxu0 %v875_v59 }
 0x306   : > { %1242 = vmatmul.msk.bf16.vlgmr.msra.gmra.mxu0 %vm695_vm2, %v865_v60 }
 0x360   : > { %v812_v61 = vpop.f32.mrf.mxu2 }
 0x361   : > { %817 = vrot.lane.b32.xlu2 %v812_v61, %s1722_s10 }
 0x368   : > { %v814_v62 = vpop.f32.mrf.mxu2 }
 0x37c   : > { %v960_v63 = vpop.f32.mrf.mxu2 }
 0x37d   : > { %965 = vrot.lane.b32.xlu2 %v960_v63, %s1723_s12 }
 0x383   : > { %v886_v0 = vpop.f32.mrf.mxu0 }
 0x384   : > { %891 = vrot.lane.b32.xlu0 %v886_v0, %s1724_s28  ;;  %v962_v1 = vpop.f32.mrf.mxu2 }
 0x38b   : > { %v888_v2 = vpop.f32.mrf.mxu0 }
 0x3bb   : > { %v818_v3 = vpop.permute.xlu2 %817 }
 0x3bc   : > { %821 = vst.msk [vmem:[#allocation5] sm:$0xff] %vm820_vm4, %v818_v3 }
 0x3d7   : > { %v966_v7 = vpop.permute.xlu2 %965 }
 0x3f6   : > { %v892_v6 = vpop.permute.xlu0 %891 }
 0x3f7   : > { %895 = vst.msk [vmem:[#allocation5] sm:$0xff] %vm894_vm5, %v892_v6 }
 0x3f8   : > { %969 = vst.msk [vmem:[#allocation5] sm:$0xff] %vm968_vm6, %v966_v7 }
 0x3ff   : > { %v970_v8 = vld [vmem:[#allocation5] sm:$0xff] }
 0x400   : > { %v971_v9 = vpack.c.bf16 %v970_v8, %v970_v8 }
 0x402   : > { %1253 = vmatmul.msk.bf16.vlgmr.msra.gmra.mxu3 %vm591_vm0, %v971_v9 }
 0x485   : > { %v1004_v11 = vpop.f32.mrf.mxu3 }
 0x486   : > { %v1005_v12 = vadd.f32 %v1390_v10, %v1004_v11 }
 0x488   : > { %1008 = vst.msk [vmem:[%s561_s24] sm:$0xff] %vm591_vm0, %v1005_v12 }
 0x489   : > { %1644 = shalt.err (!%p1641_p13)
}
 0x48a   : > { %1288 = dma.vmem_to_hbm [thread:$0]  (%p1873_p2), %s1024_s14, 128, %s1026_s23, %s1010_s29  }
 0x48d   : > { %v1006_v13 = vpop.f32.mrf.mxu3 }
 0x48e PF: > { %s2120_s15 = sld [smem:[#allocation24_spill]]  ;;  %p1314_p0 = pnand %p1194_p6, %p1880_p7 }
 0x48f   : > { %s2122_s10 = sld [smem:[#allocation26_spill]] }
 0x490   : > { %p1315_p4 = pneg %p1314_p0 }
 0x494   : > { %s1037_s12 = sand.u32 1, %s2120_s15  }
 0x495   : > { %s1038_s28 = scalar_lea.sflag [#allocation8], %s1037_s12 }
 0x496   : > { %1686 = dma.done.wait (%p1315_p4), %s1038_s28, 128  }
 0x497   : > { %1688 = vsyncadd (%p1315_p4), %s1038_s28, 4294967168  ;;  %s32_s22 = sadd.s32 1, %s2122_s10   ;;  %s2123_s21 = sld [smem:[#allocation29_spill]] }
 0x498   : > { %p29_p9 = scmp.ge.s32.totalorder %s32_s22, 4   ;;  %s2124_s20 = sld [smem:[#allocation25_spill]] }
 0x499   : > { %s2125_s26 = sld [smem:[#allocation27_spill]]  ;;  %s2126_s17 = smov %s1695_s18 }
 0x49a   : > { %s2127_s18 = smov %s1699_s19 }
 0x49b   :  { %31 = sbr.rel (!%p29_p9) target bundleno = 18 (0x12), region = 153 }
 0x49d   : > { %s2128_s19 = smov %s2123_s21 }
 0x49f   : > { %s2129_s21 = smov %s2125_s26 }
 0x4a0   :  { %1044 = vsyncpa [#allocation7], 1 }
 0x4a1   :  { %1046 = vsyncpa [#allocation7 + $0x1], 1 }
 0x4a2   :  { %1047 = vsyncpa [#allocation10], 1 }
 0x4a3   :  { %1049 = vsyncpa [#allocation10 + $0x1], 1 }
 0x4a4   :  { %1050 = vsyncpa [#allocation13], 1 }
 0x4a5   :  { %1051 = vsyncpa [#allocation16], 1 }
 0x4a6   :  { %1052 = vsyncpa [#allocation8], 1 }
 0x4a7   :  { %1054 = vsyncpa [#allocation8 + $0x1], 1 }

</bundles_post_ra>
